<compile_context>
chip_gen: v7x
topology: tpu7x:2x2x1
jax: 0.10.0
libtpu: 0.0.40
codegen_flags: <defaults>
</compile_context>

<pallas_src>
import jax
import jax.numpy as jnp
from jax.experimental import pallas as pl
from jax.experimental.pallas import tpu as pltpu

# TODO(synk): reference Swish uses undefined self.beta; assume beta = 1.0 (standard SiLU).
_SWISH_BETA = 1.0


def _swiglu_kernel(params_ref, a_ref, o_ref):
    """params_ref: SMEM f32[12] = [W00,W01,W10,W11, V00,V01,V10,V11, b0,b1, c0,c1].

    a_ref / o_ref: VMEM blocks of shape (2, TR, 128); plane p holds feature
    column p of the input/output in a lane-dense layout.
    """
    a0 = a_ref[0].astype(jnp.float32)   # (TR, 128)
    a1 = a_ref[1].astype(jnp.float32)   # (TR, 128)

    w00 = params_ref[0]; w01 = params_ref[1]
    w10 = params_ref[2]; w11 = params_ref[3]
    v00 = params_ref[4]; v01 = params_ref[5]
    v10 = params_ref[6]; v11 = params_ref[7]
    b0 = params_ref[8];  b1 = params_ref[9]
    c0 = params_ref[10]; c1 = params_ref[11]

    # 2x2 linear maps as pure VPU elementwise math (no MXU push/pop).
    lin0 = a0 * w00 + a1 * w10 + b0
    lin1 = a0 * w01 + a1 * w11 + b1
    gate0 = a0 * v00 + a1 * v10 + c0
    gate1 = a0 * v01 + a1 * v11 + c1

    # Swish gating: x * sigmoid(beta * x) -- sigmoid runs on the EUP slot.
    o_ref[0] = (lin0 * gate0 * jax.nn.sigmoid(_SWISH_BETA * gate0)).astype(o_ref.dtype)
    o_ref[1] = (lin1 * gate1 * jax.nn.sigmoid(_SWISH_BETA * gate1)).astype(o_ref.dtype)


def _round_up(x, m):
    return (x + m - 1) // m * m


def swiglu(a, b_unused, W, V, b_bias, c_bias, *, max_block_rows=1024):
    """a: (M, 2); W, V: (2, 2); b_bias, c_bias: (2,).  Returns (M, 2).

    `b_unused` mirrors the PyTorch forward signature (the module ignores it).
    """
    del b_unused  # unused by the reference module's forward
    M, K = a.shape
    assert K == 2 and W.shape == (2, 2) and V.shape == (2, 2)

    lanes = 128
    max_block_rows = max(8, _round_up(max_block_rows, 8))

    # Lane-dense row count; pad so the (rows, 128) planes tile cleanly.
    rows = _round_up(max((M + lanes - 1) // lanes, 1), 8)
    tile_rows = min(max_block_rows, rows)
    rows = _round_up(rows, tile_rows)
    m_pad = rows * lanes

    a_pad = jnp.pad(a, ((0, m_pad - M), (0, 0)))
    a_planes = a_pad.T.reshape(2, rows, lanes)          # (2, rows, 128), lane-dense

    params = jnp.concatenate(
        [W.reshape(-1), V.reshape(-1), b_bias.reshape(-1), c_bias.reshape(-1)]
    ).astype(jnp.float32)                               # (12,)

    grid = (rows // tile_rows,)
    out_planes = pl.pallas_call(
        _swiglu_kernel,
        out_shape=jax.ShapeDtypeStruct((2, rows, lanes), a.dtype),
        grid=grid,
        in_specs=[
            # Parameters live whole in SMEM: zero per-step DMA descriptors.
            pl.BlockSpec(memory_space=pltpu.MemorySpace.SMEM),
            pl.BlockSpec((2, tile_rows, lanes), lambda i: (0, i, 0)),
        ],
        out_specs=pl.BlockSpec((2, tile_rows, lanes), lambda i: (0, i, 0)),
        compiler_params=pltpu.CompilerParams(
            dimension_semantics=("parallel",),
            vmem_limit_bytes=32 * 1024 * 1024,
        ),
    )(params, a_planes)

    return out_planes.reshape(2, m_pad).T[:M]


if __name__ == "__main__":
    key = jax.random.PRNGKey(0)
    k_a, k_b, k_w, k_v, k_bb, k_cc = jax.random.split(key, 6)

    # Small demo: 2500 rows (not a multiple of 128 -> exercises tail padding);
    # feature dim is fixed at 2 by the module.  Small 8x128-row tiles exercise
    # the multi-step grid even at this small size.
    M = 2500
    a = jax.random.normal(k_a, (M, 2), dtype=jnp.float32)
    b_in = jax.random.normal(k_b, (M, 2), dtype=jnp.float32)   # unused by forward

    # Deterministic parameter init (module __init__ uses torch.randn of these shapes).
    W = jax.random.normal(k_w, (2, 2), dtype=jnp.float32)
    V = jax.random.normal(k_v, (2, 2), dtype=jnp.float32)
    bias_b = jax.random.normal(k_bb, (2,), dtype=jnp.float32)
    bias_c = jax.random.normal(k_cc, (2,), dtype=jnp.float32)

    out = swiglu(a, b_in, W, V, bias_b, bias_c, max_block_rows=8)
    jax.block_until_ready(out)

    # Pure-JAX reference: (a @ W + b) * swish(a @ V + c), swish beta = 1.
    gate = a @ V + bias_c
    ref = (a @ W + bias_b) * (gate * jax.nn.sigmoid(_SWISH_BETA * gate))
    assert out.shape == ref.shape
    assert jnp.allclose(out, ref, atol=1e-5, rtol=1e-5), "mismatch vs reference"

    print("KERNEL_OK")
</pallas_src>

<mosaic_0001>
module attributes {stable_mosaic.version = 11 : i64} {
  func.func @_swiglu_kernel(%arg0: i32, %arg1: memref<12xf32, #tpu.memory_space<smem>>, %arg2: memref<2x8x128xf32, #tpu.memory_space<vmem>>, %arg3: memref<2x8x128xf32, #tpu.memory_space<vmem>>) attributes {dimension_semantics = [#tpu.dimension_semantics<parallel>], iteration_bounds = array<i64: 3>, scalar_prefetch = 0 : i64, scratch_operands = 0 : i64, tpu.core_type = #tpu.core_type<tc>, window_params = [{transform_indices = @transform_0, window_bounds = array<i64: 12>}, {transform_indices = @transform_1, window_bounds = array<i64: 2, 8, 128>}, {transform_indices = @transform_2, window_bounds = array<i64: 2, 8, 128>}]} {
    %c0 = arith.constant 0 : index
    %c0_0 = arith.constant 0 : index
    %c0_1 = arith.constant 0 : index
    %0 = vector.load %arg2[%c0, %c0_0, %c0_1] : memref<2x8x128xf32, #tpu.memory_space<vmem>>, vector<1x8x128xf32>
    %1 = vector.shape_cast %0 : vector<1x8x128xf32> to vector<8x128xf32>
    %c1 = arith.constant 1 : index
    %c0_2 = arith.constant 0 : index
    %c0_3 = arith.constant 0 : index
    %2 = vector.load %arg2[%c1, %c0_2, %c0_3] : memref<2x8x128xf32, #tpu.memory_space<vmem>>, vector<1x8x128xf32>
    %3 = vector.shape_cast %2 : vector<1x8x128xf32> to vector<8x128xf32>
    %c0_4 = arith.constant 0 : index
    %4 = memref.load %arg1[%c0_4] : memref<12xf32, #tpu.memory_space<smem>>
    %c1_5 = arith.constant 1 : index
    %5 = memref.load %arg1[%c1_5] : memref<12xf32, #tpu.memory_space<smem>>
    %c2 = arith.constant 2 : index
    %6 = memref.load %arg1[%c2] : memref<12xf32, #tpu.memory_space<smem>>
    %c3 = arith.constant 3 : index
    %7 = memref.load %arg1[%c3] : memref<12xf32, #tpu.memory_space<smem>>
    %c4 = arith.constant 4 : index
    %8 = memref.load %arg1[%c4] : memref<12xf32, #tpu.memory_space<smem>>
    %c5 = arith.constant 5 : index
    %9 = memref.load %arg1[%c5] : memref<12xf32, #tpu.memory_space<smem>>
    %c6 = arith.constant 6 : index
    %10 = memref.load %arg1[%c6] : memref<12xf32, #tpu.memory_space<smem>>
    %c7 = arith.constant 7 : index
    %11 = memref.load %arg1[%c7] : memref<12xf32, #tpu.memory_space<smem>>
    %c8 = arith.constant 8 : index
    %12 = memref.load %arg1[%c8] : memref<12xf32, #tpu.memory_space<smem>>
    %c9 = arith.constant 9 : index
    %13 = memref.load %arg1[%c9] : memref<12xf32, #tpu.memory_space<smem>>
    %c10 = arith.constant 10 : index
    %14 = memref.load %arg1[%c10] : memref<12xf32, #tpu.memory_space<smem>>
    %c11 = arith.constant 11 : index
    %15 = memref.load %arg1[%c11] : memref<12xf32, #tpu.memory_space<smem>>
    %16 = vector.broadcast %4 : f32 to vector<8x128xf32>
    %17 = arith.mulf %1, %16 : vector<8x128xf32>
    %18 = vector.broadcast %6 : f32 to vector<8x128xf32>
    %19 = arith.mulf %3, %18 : vector<8x128xf32>
    %20 = arith.addf %17, %19 : vector<8x128xf32>
    %21 = vector.broadcast %12 : f32 to vector<8x128xf32>
    %22 = arith.addf %20, %21 : vector<8x128xf32>
    %23 = vector.broadcast %5 : f32 to vector<8x128xf32>
    %24 = arith.mulf %1, %23 : vector<8x128xf32>
    %25 = vector.broadcast %7 : f32 to vector<8x128xf32>
    %26 = arith.mulf %3, %25 : vector<8x128xf32>
    %27 = arith.addf %24, %26 : vector<8x128xf32>
    %28 = vector.broadcast %13 : f32 to vector<8x128xf32>
    %29 = arith.addf %27, %28 : vector<8x128xf32>
    %30 = vector.broadcast %8 : f32 to vector<8x128xf32>
    %31 = arith.mulf %1, %30 : vector<8x128xf32>
    %32 = vector.broadcast %10 : f32 to vector<8x128xf32>
    %33 = arith.mulf %3, %32 : vector<8x128xf32>
    %34 = arith.addf %31, %33 : vector<8x128xf32>
    %35 = vector.broadcast %14 : f32 to vector<8x128xf32>
    %36 = arith.addf %34, %35 : vector<8x128xf32>
    %37 = vector.broadcast %9 : f32 to vector<8x128xf32>
    %38 = arith.mulf %1, %37 : vector<8x128xf32>
    %39 = vector.broadcast %11 : f32 to vector<8x128xf32>
    %40 = arith.mulf %3, %39 : vector<8x128xf32>
    %41 = arith.addf %38, %40 : vector<8x128xf32>
    %42 = vector.broadcast %15 : f32 to vector<8x128xf32>
    %43 = arith.addf %41, %42 : vector<8x128xf32>
    %44 = arith.mulf %22, %36 : vector<8x128xf32>
    %cst = arith.constant 1.000000e+00 : f32
    %45 = vector.broadcast %cst : f32 to vector<8x128xf32>
    %46 = arith.mulf %45, %36 : vector<8x128xf32>
    %47 = arith.negf %46 : vector<8x128xf32>
    %48 = math.exp %47 : vector<8x128xf32>
    %cst_6 = arith.constant 1.000000e+00 : f32
    %49 = vector.broadcast %cst_6 : f32 to vector<8x128xf32>
    %50 = arith.addf %49, %48 : vector<8x128xf32>
    %51 = arith.divf %49, %50 : vector<8x128xf32>
    %52 = arith.mulf %44, %51 : vector<8x128xf32>
    %c0_7 = arith.constant 0 : index
    %c0_8 = arith.constant 0 : index
    %c0_9 = arith.constant 0 : index
    %53 = vector.load %arg3[%c0_7, %c0_8, %c0_9] : memref<2x8x128xf32, #tpu.memory_space<vmem>>, vector<1x8x128xf32>
    %54 = vector.shape_cast %53 : vector<1x8x128xf32> to vector<8x128xf32>
    %55 = vector.shape_cast %52 : vector<8x128xf32> to vector<1x8x128xf32>
    tpu.vector_store %arg3[%c0_7, %c0_8, %c0_9], %55 {strides = array<i32>} : memref<2x8x128xf32, #tpu.memory_space<vmem>>, vector<1x8x128xf32>,
    %56 = arith.mulf %29, %43 : vector<8x128xf32>
    %cst_10 = arith.constant 1.000000e+00 : f32
    %57 = vector.broadcast %cst_10 : f32 to vector<8x128xf32>
    %58 = arith.mulf %57, %43 : vector<8x128xf32>
    %59 = arith.negf %58 : vector<8x128xf32>
    %60 = math.exp %59 : vector<8x128xf32>
    %cst_11 = arith.constant 1.000000e+00 : f32
    %61 = vector.broadcast %cst_11 : f32 to vector<8x128xf32>
    %62 = arith.addf %61, %60 : vector<8x128xf32>
    %63 = arith.divf %61, %62 : vector<8x128xf32>
    %64 = arith.mulf %56, %63 : vector<8x128xf32>
    %c1_12 = arith.constant 1 : index
    %c0_13 = arith.constant 0 : index
    %c0_14 = arith.constant 0 : index
    %65 = vector.load %arg3[%c1_12, %c0_13, %c0_14] : memref<2x8x128xf32, #tpu.memory_space<vmem>>, vector<1x8x128xf32>
    %66 = vector.shape_cast %65 : vector<1x8x128xf32> to vector<8x128xf32>
    %67 = vector.shape_cast %64 : vector<8x128xf32> to vector<1x8x128xf32>
    tpu.vector_store %arg3[%c1_12, %c0_13, %c0_14], %67 {strides = array<i32>} : memref<2x8x128xf32, #tpu.memory_space<vmem>>, vector<1x8x128xf32>,
    return
  }
  func.func @transform_0(%arg0: i32) -> i32 {
    %c0_i32 = arith.constant 0 : i32
    %c0_i32_0 = arith.constant 0 : i32
    return %c0_i32 : i32
  }
  func.func @transform_1(%arg0: i32) -> (i32, i32, i32) {
    %c0_i32 = arith.constant 0 : i32
    %c0_i32_0 = arith.constant 0 : i32
    %c0_i32_1 = arith.constant 0 : i32
    return %c0_i32, %arg0, %c0_i32_0 : i32, i32, i32
  }
  func.func @transform_2(%arg0: i32) -> (i32, i32, i32) {
    %c0_i32 = arith.constant 0 : i32
    %c0_i32_0 = arith.constant 0 : i32
    %c0_i32_1 = arith.constant 0 : i32
    return %c0_i32, %arg0, %c0_i32_0 : i32, i32, i32
  }
}

</mosaic_0001>

<bundles_post_ra>
// kernel: tpu_custom_call.1
= control target key start
LH: loop header
LB: loop body
LE: loop exit
PB: predicated region body
PF: predicated region fallthrough
CT: control target
= control target key end

     0   :  { %7 = vsyncpa [#allocation5], 0  ;;  %s764_s0 = inlined_call_operand.hbm [shape: f32[12], index: 0, kind: input, shape index: {}]   ;;  %s765_s1 = inlined_call_operand.hbm [shape: f32[2,24,128], index: 1, kind: input, shape index: {}]   ;;  %s766_s2 = inlined_call_operand.hbm [shape: f32[2,24,128], index: 2, kind: output, shape index: {}]  }
   0x1   :  { %8 = vsyncpa [#allocation3], 0 }
   0x2   :  { %10 = vsyncpa [#allocation3 + $0x1], 0 }
   0x3   :  { %11 = vsyncpa [#allocation4], 0 }
   0x4   :  { %13 = vsyncpa [#allocation4 + $0x1], 0  ;;  %s572_s9 = smov 0   ;;  %s574_s10 = smov 0  }
   0x5   :  { %s576_s11 = smov 0   ;;  %s578_s12 = smov 0  }
   0x6 LB: > { %s593_s13 = sadd.s32 4294967295, %s546_s12   ;;  %s333_s14 = sadd.s32 4294967294, %s546_s12   ;;  %s546_s12 = sphi %s578_s12, %s784_s12   ;;  %s542_s11 = sphi %s576_s11, %s783_s11   ;;  %s538_s10 = sphi %s574_s10, %s782_s10   ;;  %s534_s9 = sphi %s572_s9, %s781_s9  }
   0x7   : > { %s597_s15 = sadd.s32 1, %s546_s12   ;;  %s47_s16 = sadd.s32 1, %s542_s11 }
   0x8   : > { %s44_s17 = ssub.s32 %s546_s12, %s597_s15  ;;  %p54_p0 = scmp.ne.s32.totalorder %s542_s11, %s538_s10 }
   0x9   : > { %p45_p1 = scmp.eq.s32.totalorder %s44_s17, 0  ;;  %p55_p2 = scmp.eq.s32.totalorder %s546_s12, 0 }
   0xa   : > { %p60_p3 = scmp.ne.s32.totalorder %s538_s10, %s534_s9  ;;  %p768_p4 = scmp.eq.s32.totalorder %s593_s13, 0 }
   0xb   : > { %s609_s18 = scalar_select %p45_p1, %s542_s11, %s47_s16  }
   0xc   : > { %p611_p5 = por %p55_p2, %p54_p0  ;;  %p617_p6 = por %p768_p4, %p60_p3 }
   0xd   : > { %p84_p7 = scmp.eq.s32.totalorder %s593_s13, 2  ;;  %p90_p8 = scmp.eq.s32.totalorder %s333_s14, 2 }
   0xe   : > { %s771_s20 = scalar_select %p617_p6, 1, 0 }
   0xf   : > { %p334_p9 = scmp.ge.s32.totalorder %s546_s12, 1  ;;  %p97_p10 = scmp.lt.s32.totalorder %s546_s12, 4 }
  0x10   : > { %p624_p11 = por %p84_p7, %p54_p0  ;;  %p628_p12 = por %p90_p8, %p60_p3 }
  0x11   : > { %p632_p13 = pnand %p334_p9, %p97_p10  ;;  %p383_p2 = scmp.lt.s32.totalorder %s546_s12, 3 }
  0x12   : > { %s772_s21 = scalar_select %p624_p11, 1, 0 }
  0x13   : > { %s773_s22 = scalar_select %p628_p12, 1, 0 }
  0x14   : > { %p370_p1 = pneg %p632_p13  ;;  %s119_s24 = sand.u32 1, %s542_s11  }
  0x15   : > { %s338_s25 = sshll.u32 %s546_s12, 7  ;;  %p645_p0 = pnand %p383_p2, %p611_p5 }
  0x16   : > { %p371_p6 = pnand %p370_p1, %p768_p4  ;;  %s337_s27 = sshll.u32 %s119_s24, 4 }
  0x17   : > { %s433_s30 = scalar_lea.hbm %s764_s0, 16 }
  0x18   : > { %p434_p3 = scmp.ne.s32.totalorder %s764_s0, %s433_s30  ;;  %p435_p7 = pneg %p371_p6 }
  0x19   : > { %p440_p10 = scmp.lt.u32.totalorder %s433_s30, %s764_s0 }
  0x1a   : > { %p436_p8 = pnand %p435_p7, %p434_p3 }
  0x1c   : > { %p437_p9 = pneg %p436_p8 }
  0x1e   : > { %p442_p5 = pnand %p440_p10, %p437_p9 }
  0x20   : > { %445 = shalt.err (!%p442_p5)
}
  0x21   : > { %s548_s7 = smov [#allocation2]   ;;  %s664_s19 = scalar_lea.hbm %s765_s1, %s338_s25 }
  0x22   : > { %373 = dma.hbm_to_smem (!%p371_p6), %s764_s0, 16, %s548_s7, [#allocation5]  }
  0x23   : > { %s123_s28 = scalar_lea.vmem [#allocation6], %s337_s27  ;;  %s668_s30 = scalar_lea.sflag [#allocation3], %s119_s24 }
  0x24   : > { %s129_s29 = sshll.u32 %s123_s28, 4  ;;  %s446_s3 = scalar_lea.hbm %s664_s19, 256  ;;  %s666_s29 = int_to_ptr.vmem [resolvable:$true] %s129_s29 }
  0x25   : > { %p447_p1 = scmp.ne.s32.totalorder %s664_s19, %s446_s3  ;;  %p448_p2 = pneg %p645_p0 }
  0x26   : > { %s451_s5 = scalar_lea.hbm %s765_s1, 768  ;;  %p452_p7 = scmp.lt.u32.totalorder %s664_s19, %s765_s1 }
  0x27   : > { %p449_p6 = pnand %p448_p2, %p447_p1  ;;  %p453_p8 = scmp.lt.u32.totalorder %s451_s5, %s446_s3 }
  0x28   : > { %p455_p10 = scmp.lt.u32.totalorder %s446_s3, %s664_s19 }
  0x29   : > { %p450_p3 = pneg %p449_p6  ;;  %p454_p9 = por %p453_p8, %p452_p7 }
  0x2b   : > { %p456_p5 = por %p455_p10, %p454_p9 }
  0x2d   : > { %p457_p4 = pnand %p456_p5, %p450_p3 }
  0x2f   : > { %460 = shalt.err (!%p457_p4)
}
  0x30   : > { %s461_s24 = scalar_lea.vmem %s666_s29, 256  ;;  %s549_s27 = smov [#allocation6]  }
  0x31   : > { %p462_p1 = scmp.ne.s32.totalorder %s666_s29, %s461_s24  ;;  %s466_s8 = sshll.u32 %s549_s27, 4  ;;  %s467_s8 = int_to_ptr.vmem [resolvable:$false] %s466_s8 }
  0x32   : > { %s468_s14 = scalar_lea.vmem %s467_s8, 512  ;;  %p469_p11 = scmp.lt.s32.totalorder %s666_s29, %s467_s8 }
  0x33   : > { %p464_p6 = pnand %p462_p1, %p448_p2  ;;  %p470_p7 = scmp.lt.s32.totalorder %s468_s14, %s461_s24 }
  0x35   : > { %p465_p12 = pneg %p464_p6  ;;  %p471_p8 = por %p470_p7, %p469_p11 }
  0x37   : > { %p472_p9 = pnand %p471_p8, %p465_p12 }
  0x39   : > { %475 = shalt.err (!%p472_p9)
}
  0x3a   : > { %s550_s16 = smov 384   ;;  %s551_s17 = smov 128  }
  0x3b   : > { %s552_s28 = smov 8   ;;  %141 = sbr.rel (%p632_p13) target bundleno = 132 (0x84), region = 28 }
  0x3c   : > { %377 = dma.hbm_to_vmem [thread:$0]  (!%p645_p0), %s664_s19, 256, %s666_s29, %s668_s30, %s550_s16, %s551_s17, %s552_s28  }
  0x3d   : > { %p776_p4 = scmp.eq.s32.totalorder (!%p632_p13), %s593_s13, 0 }
  0x42   : > { %521 = dma.done.wait (%p776_p4), [#allocation5], 16   ;;  %p777_p2 = pmov %p776_p4 }
  0x43   : > { %s703_s3 = sand.u32 1, %s538_s10   ;;  %p778_p11 = scmp.ne.s32.totalorder %s771_s20, 0 }
  0x44   : > { %523 = vsyncadd (%p777_p2), [#allocation5], 4294967280  ;;  %s341_s25 = sshll.u32 %s703_s3, 4  ;;  %s148_s4 = scalar_lea.sflag [#allocation3], %s703_s3 }
  0x45   : > { %s151_s26 = scalar_lea.vmem [#allocation6], %s341_s25 }
  0x46   : > { %525 = dma.done.wait (%p778_p11), %s148_s4, 256  }
  0x47   : > { %527 = vsyncadd (%p778_p11), %s148_s4, 4294967040 }
  0x48   : > { %156 = sfence }
  0x49   : > { %s347_s23 = sld [smem:[#allocation2 + $0x4]]  ;;  %s349_s19 = sld [smem:[#allocation2 + $0x6]]  ;;  %v173_v0 = vld [vmem:[%s151_s26] sm:$0xff]  ;;  %v343_v1 = vld [vmem:[%s151_s26 + $0x8] sm:$0xff] }
  0x4a   : > { %s353_s29 = sld [smem:[#allocation2 + $0xa]]  ;;  %s348_s30 = sld [smem:[#allocation2 + $0x5]] }
  0x4b   : > { %s350_s5 = sld [smem:[#allocation2 + $0x7]]  ;;  %s354_s6 = sld [smem:[#allocation2 + $0xb]] }
  0x4c   : > { %s176_s20 = sld [smem:[#allocation2]]  ;;  %s345_s7 = sld [smem:[#allocation2 + $0x2]] }
  0x4d   : > { %s344_s24 = sld [smem:[#allocation2 + $0x1]]  ;;  %s346_s27 = sld [smem:[#allocation2 + $0x3]] }
  0x4e   : > { %s351_s8 = sld [smem:[#allocation2 + $0x8]]  ;;  %s352_s14 = sld [smem:[#allocation2 + $0x9]] }
  0x4f   : > { %v202_v2 = vstv %s347_s23  ;;  %v204_v4 = vstv %s349_s19  ;;  %s172_s16 = scalar_lea.vmem [#allocation7], %s341_s25  ;;  %s359_s28 = sshll.u32 %s593_s13, 7 }
  0x50   : > { %v203_v3 = vmul.f32 %v202_v2, %v173_v0  ;;  %v205_v5 = vmul.f32 %v343_v1, %v204_v4  ;;  %v207_v6 = vstv %s353_s29  ;;  %v209_v8 = vstv %s348_s30  ;;  %s248_s17 = sshll.u32 %s172_s16, 4  ;;  %s721_s23 = scalar_lea.hbm %s766_s2, %s359_s28  ;;  %s716_s17 = int_to_ptr.vmem [resolvable:$true] %s248_s17 }
  0x51   : > { %v210_v9 = vmul.f32 %v209_v8, %v173_v0  ;;  %v211_v11 = vstv %s350_s5  ;;  %v214_v14 = vstv %s354_s6  ;;  %s236_s19 = scalar_lea.sflag [#allocation4], %s703_s3  ;;  %s476_s29 = scalar_lea.vmem %s716_s17, 256 }
  0x52   : > { %v206_v7 = vadd.f32 %v205_v5, %v203_v3  ;;  %v212_v12 = vmul.f32 %v343_v1, %v211_v11  ;;  %v188_v18 = vstv %s176_s20  ;;  %v190_v19 = vstv %s345_s7  ;;  %p477_p12 = scmp.ne.s32.totalorder %s716_s17, %s476_s29  ;;  %p779_p13 = scmp.ne.s32.totalorder %s772_s21, 0 }
  0x53   : > { %v189_v20 = vmul.f32 %v188_v18, %v173_v0  ;;  %v191_v21 = vmul.f32 %v343_v1, %v190_v19  ;;  %v195_v23 = vstv %s344_s24  ;;  %v197_v24 = vstv %s346_s27  ;;  %s553_s13 = smov [#allocation7]  }
  0x54   : > { %v208_v10 = vadd.f32 %v207_v6, %v206_v7  ;;  %v213_v15 = vadd.f32 %v212_v12, %v210_v9  ;;  %v193_v27 = vstv %s351_s8  ;;  %v196_v28 = vmul.f32 %v195_v23, %v173_v0  ;;  %p478_p0 = pnand %p477_p12, %p779_p13  ;;  %s480_s25 = sshll.u32 %s553_s13, 4  ;;  %s481_s25 = int_to_ptr.vmem [resolvable:$false] %s480_s25 }
  0x55   : > { %v192_v26 = vadd.f32 %v191_v21, %v189_v20  ;;  %v198_v29 = vmul.f32 %v343_v1, %v197_v24  ;;  %v200_v34 = vstv %s352_s14  ;;  %s482_s30 = scalar_lea.vmem %s481_s25, 512  ;;  %p483_p10 = scmp.lt.s32.totalorder %s716_s17, %s481_s25 }
  0x56   : > { %v355_v13 = vmul.f32 -1.442695, %v208_v10  ;;  %v215_v16 = vadd.f32 %v214_v14, %v213_v15  ;;  %p479_p3 = pneg %p478_p0  ;;  %p484_p5 = scmp.lt.s32.totalorder %s482_s30, %s476_s29 }
  0x57   : > { %v194_v31 = vadd.f32 %v193_v27, %v192_v26  ;;  %v199_v33 = vadd.f32 %v198_v29, %v196_v28 }
  0x58   : > { %425 = vpow2.f32 %v355_v13  ;;  %v356_v17 = vmul.f32 -1.442695, %v215_v16  ;;  %p485_p1 = por %p484_p5, %p483_p10 }
  0x59   : > { %v216_v35 = vmul.f32 %v208_v10, %v194_v31  ;;  %v201_v36 = vadd.f32 %v200_v34, %v199_v33 }
  0x5a   : > { %427 = vpow2.f32 %v356_v17  ;;  %p486_p6 = pnand %p485_p1, %p479_p3 }
  0x5b   : > { %v225_v39 = vmul.f32 %v215_v16, %v201_v36 }
  0x62   : > { %v426_v22 = vpop.eup %425 }
  0x63   : > { %v220_v25 = vadd.f32 1.0, %v426_v22 }
  0x64   : > { %v428_v30 = vpop.eup %427 }
  0x65   : > { %429 = vrcp.f32 %v220_v25  ;;  %v229_v32 = vadd.f32 1.0, %v428_v30 }
  0x67   : > { %431 = vrcp.f32 %v229_v32 }
  0x6f   : > { %v430_v37 = vpop.eup %429 }
  0x70   : > { %v223_v38 = vmul.f32 %v430_v37, %v216_v35 }
  0x71   : > { %v432_v40 = vpop.eup %431 }
  0x72   : > { %224 = vst [vmem:[%s172_s16] sm:$0xff] %v223_v38  ;;  %v232_v41 = vmul.f32 %v432_v40, %v225_v39 }
  0x74   : > { %357 = vst [vmem:[%s172_s16 + $0x8] sm:$0xff] %v232_v41 }
  0x75   : > { %489 = shalt.err (!%p486_p6)
}
  0x76   : > { %s490_s5 = scalar_lea.hbm %s721_s23, 256  ;;  %s494_s7 = scalar_lea.hbm %s766_s2, 768 }
  0x77   : > { %p491_p7 = scmp.ne.s32.totalorder %s721_s23, %s490_s5  ;;  %p495_p4 = scmp.lt.u32.totalorder %s721_s23, %s766_s2 }
  0x78   : > { %p496_p2 = scmp.lt.u32.totalorder %s494_s7, %s490_s5  ;;  %p498_p12 = scmp.lt.u32.totalorder %s490_s5, %s721_s23 }
  0x79   : > { %p492_p8 = pnand %p491_p7, %p779_p13 }
  0x7a   : > { %p497_p11 = por %p496_p2, %p495_p4 }
  0x7b   : > { %p493_p9 = pneg %p492_p8 }
  0x7c   : > { %p499_p0 = por %p498_p12, %p497_p11 }
  0x7e   : > { %p500_p3 = pnand %p499_p0, %p493_p9 }
  0x80   : > { %503 = shalt.err (!%p500_p3)
}
  0x81   : > { %s554_s8 = smov 128   ;;  %s555_s14 = smov 384  }
  0x82   : > { %s556_s16 = smov 8  }
  0x83   : > { %368 = dma.vmem_to_hbm [thread:$0]  (%p779_p13), %s716_s17, 256, %s721_s23, %s236_s19, %s554_s8, %s555_s14, %s556_s16  }
  0x84 PF: > { %p385_p10 = scmp.ge.s32.totalorder %s546_s12, 2  ;;  %s263_s28 = sand.u32 1, %s534_s9  }
  0x85   : > { %p780_p5 = scmp.ne.s32.totalorder %s773_s22, 0  ;;  %s264_s4 = scalar_lea.sflag [#allocation4], %s263_s28 }
  0x87   : > { %p379_p1 = pnand %p385_p10, %p780_p5 }
  0x89   : > { %529 = dma.done.wait (!%p379_p1), %s264_s4, 256  }
  0x8a   : > { %531 = vsyncadd (!%p379_p1), %s264_s4, 4294967040  ;;  %p16_p6 = scmp.ge.s32.totalorder %s597_s15, 5   ;;  %s781_s9 = smov %s538_s10 }
  0x8b   : > { %s782_s10 = smov %s542_s11  ;;  %s783_s11 = smov %s609_s18 }
  0x8c   : > { %s784_s12 = smov %s597_s15  ;;  %18 = sbr.rel (!%p16_p6) target bundleno = 6 (0x6), region = 80 }
  0x93   :  { %269 = vsyncpa [#allocation3], 1 }
  0x94   :  { %271 = vsyncpa [#allocation3 + $0x1], 1 }
  0x95   :  { %272 = vsyncpa [#allocation4], 1 }
  0x96   :  { %274 = vsyncpa [#allocation4 + $0x1], 1 }
  0x97   :  { %275 = vsyncpa [#allocation5], 1 }
  0x98   :  { %277 = vsyncpa [#allocation5 + $0x1], 1 }

</bundles_post_ra>
